<compile_context>
chip_gen: v7x
topology: tpu7x:2x2x1
jax: 0.10.0
libtpu: 0.0.40
codegen_flags: <defaults>
</compile_context>

<pallas_src>
import jax
import jax.numpy as jnp
from jax.experimental import pallas as pl
from jax.experimental.pallas import tpu as pltpu

_LANE = 128


# ----------------------------------------------------------------------------- kernel


def _make_mlp_max_kernel(num_layers, has_points, D, tn, n_valid, needs_mask,
                         points_fma, use_bf16_matmul):
    """Per-(batch, N-tile) body: channels-first pointwise MLP + running max over N."""
    n_data = 2 if has_points else 1
    n_lane_blocks = tn // _LANE

    def kernel(*refs):
        out_ref = refs[-2]          # (1, Clast, 1), resident across the N axis
        max_ref = refs[-1]          # VMEM scratch (Clast, 128): lane-blocked running max
        data_refs = refs[:n_data]   # xyz (1,3,tn) [, points (1,D,tn)]
        prm = refs[n_data:-2]       # folded (W, b) per layer (MXU weights pre-cast bf16)

        ni = pl.program_id(1)

        p = 0
        w0x = prm[p][...]; p += 1                       # (C0, 3)  f32
        if has_points:
            w0p = prm[p][...]; p += 1                   # (C0, D)  f32 (FMA) / bf16 (MXU)
        b0 = prm[p][...]; p += 1                        # (C0, 1)  f32

        # ---- layer 0: torch's concat([xyz, points]) realized as split contributions.
        # K=3 would underfill the MXU, so xyz (and small-D points) use VPU broadcast-FMA
        # (outer-product accumulation over channels); elementwise math stays f32.
        xr = data_refs[0][0].astype(jnp.float32)        # (3, tn)
        h = w0x[:, 0:1] * xr[0:1, :]
        for c in range(1, 3):
            h = h + w0x[:, c:c + 1] * xr[c:c + 1, :]
        if has_points:
            if points_fma:
                pr = data_refs[1][0].astype(jnp.float32)
                for c in range(D):
                    h = h + w0p[:, c:c + 1] * pr[c:c + 1, :]
            else:
                # streamed points are already in the matmul dtype (bf16 or f32)
                h = h + jnp.dot(w0p, data_refs[1][0],
                                preferred_element_type=jnp.float32)
        h = jnp.maximum(h + b0, 0.0)                    # (C0, tn) f32

        # ---- layers 1..L-1: MXU matmuls; weights were bf16-cast once in the wrapper.
        for _ in range(1, num_layers):
            w = prm[p][...]
            b = prm[p + 1][...]
            p += 2
            a = h.astype(w.dtype) if use_bf16_matmul else h
            h = jnp.maximum(jnp.dot(w, a, preferred_element_type=jnp.float32) + b, 0.0)

        # ---- mask padded point columns (they carry relu(bias-chain) garbage).
        if needs_mask:
            col = jax.lax.broadcasted_iota(jnp.int32, (1, tn), 1) + ni * tn
            h = jnp.where(col < n_valid, h, 0.0)

        # ---- lane-blocked partial max: pure VPU maxima across 128-lane slabs (no XLU).
        part = h[:, 0:_LANE]
        for j in range(1, n_lane_blocks):
            part = jnp.maximum(part, h[:, j * _LANE:(j + 1) * _LANE])

        @pl.when(ni == 0)
        def _():
            max_ref[...] = jnp.zeros_like(max_ref)      # post-ReLU values are >= 0

        max_ref[...] = jnp.maximum(max_ref[...], part)

        # ---- single cross-lane reduce + one output store per batch element.
        @pl.when(ni == pl.num_programs(1) - 1)
        def _():
            out_ref[0] = jnp.max(max_ref[...], axis=1,
                                 keepdims=True).astype(out_ref.dtype)

    return kernel


# ----------------------------------------------------------------------------- sizing


def _round_up(x, m):
    return ((x + m - 1) // m) * m


def _vmem_capacity_bytes():
    try:
        info = pltpu.get_tpu_info()
        cap = getattr(info, "vmem_capacity_bytes", None)
        if cap:
            return int(cap)
    except Exception:
        pass
    return 64 * 1024 * 1024           # conservative fallback (v7x per-TensorCore)


def _pick_tile_n(n128, d, couts, in_bytes, w_bytes_total, clast, max_tn=2048):
    """Largest 128-multiple point tile whose estimated footprint fits the VMEM budget."""
    cap = _vmem_capacity_bytes()
    budget = int(cap * 0.5)           # headroom for pipelining / compiler scratch
    ch_in = max(3 + d, 8)
    act_c = max(couts)
    tn = max(_LANE, (min(max_tn, n128) // _LANE) * _LANE)
    while tn > _LANE:
        streamed = 2 * ch_in * tn * in_bytes            # double-buffered input tiles
        acts = 3 * act_c * tn * 4                       # live f32 activations (+bf16 copy)
        footprint = streamed + 2 * w_bytes_total + acts + clast * _LANE * 4 + (1 << 20)
        if footprint <= budget:
            break
        tn -= _LANE
    vmem_limit = min(int(cap * 3 // 4), 112 * 1024 * 1024)
    return tn, vmem_limit


# ----------------------------------------------------------------------------- wrapper


def pointnet_set_abstraction_group_all(xyz, points, folded_params, *,
                                       use_bf16_matmul=True,
                                       points_fma_max_channels=8,
                                       max_tile_n=2048):
    """
    Forward pass of PointNetSetAbstraction with group_all=True.

    xyz:           [B, 3, N]  float32
    points:        [B, D, N]  float32 or None
    folded_params: list of (W (Cout, Cin), b (Cout, 1)) with Conv bias + eval BN folded.

    Returns:
      new_xyz:    [B, 3, 1]
      new_points: [B, C_last, 1]
      Qmatrix:    scalar int32 (torch.tensor(0) equivalent)
    """
    B, C3, N = xyz.shape
    assert C3 == 3, "xyz must be [B, 3, N]"
    has_points = points is not None
    D = points.shape[1] if has_points else 0
    num_layers = len(folded_params)
    couts = [int(w.shape[0]) for (w, _) in folded_params]
    Clast = couts[-1]
    assert folded_params[0][0].shape[1] == 3 + D

    points_fma = has_points and (D <= points_fma_max_channels)
    in_dtype = jnp.bfloat16 if use_bf16_matmul else jnp.float32
    w_mxu_dtype = jnp.bfloat16 if use_bf16_matmul else jnp.float32

    # --- params: conv bias + eval BN already folded; MXU weights cast to bf16 ONCE here.
    W0, b0 = folded_params[0]
    param_arrays = [W0[:, :3].astype(jnp.float32)]
    if has_points:
        param_arrays.append(
            W0[:, 3:].astype(jnp.float32 if points_fma else w_mxu_dtype))
    param_arrays.append(b0.astype(jnp.float32))
    for (Wi, bi) in folded_params[1:]:
        param_arrays.append(Wi.astype(w_mxu_dtype))
        param_arrays.append(bi.astype(jnp.float32))
    w_bytes_total = sum(int(a.size) * a.dtype.itemsize for a in param_arrays)

    # --- point-axis tiling: pad to a 128-multiple, mask the pad inside the kernel.
    in_bytes = 2 if use_bf16_matmul else 4
    n128 = _round_up(N, _LANE)
    tn_max, vmem_limit = _pick_tile_n(n128, D, couts, in_bytes, w_bytes_total, Clast,
                                      max_tn=max_tile_n)
    n_tiles = -(-n128 // tn_max)
    tn = _round_up(-(-n128 // n_tiles), _LANE)       # balance tiles, minimize padding
    n_pad = tn * n_tiles
    needs_mask = (n_pad != N)

    def pad_cast(a):
        a = a.astype(in_dtype)
        if n_pad != N:
            a = jnp.pad(a, ((0, 0), (0, 0), (0, n_pad - N)))
        return a

    inputs = [pad_cast(xyz)]
    in_specs = [pl.BlockSpec((1, 3, tn), lambda b, n: (b, 0, n))]
    if has_points:
        inputs.append(pad_cast(points))
        in_specs.append(pl.BlockSpec((1, D, tn), lambda b, n: (b, 0, n)))

    const_idx = lambda b, n: (0, 0)   # params fetched once, stay VMEM resident
    for arr in param_arrays:
        inputs.append(arr)
        in_specs.append(pl.BlockSpec(arr.shape, const_idx))

    out_spec = pl.BlockSpec((1, Clast, 1), lambda b, n: (b, 0, 0))

    cins = [int(w.shape[1]) for (w, _) in folded_params]
    flops = 2 * B * N * sum(ci * co for ci, co in zip(cins, couts))
    bytes_accessed = int(in_bytes * (3 + D) * B * n_pad + w_bytes_total + 4 * B * Clast)

    kernel = _make_mlp_max_kernel(num_layers, has_points, D, tn, N, needs_mask,
                                  points_fma, use_bf16_matmul)

    new_points = pl.pallas_call(
        kernel,
        out_shape=jax.ShapeDtypeStruct((B, Clast, 1), jnp.float32),
        grid=(B, n_tiles),
        in_specs=in_specs,
        out_specs=out_spec,
        scratch_shapes=[pltpu.VMEM((Clast, _LANE), jnp.float32)],
        compiler_params=pltpu.CompilerParams(
            dimension_semantics=("parallel", "arbitrary"),
            vmem_limit_bytes=vmem_limit,
        ),
        cost_estimate=pl.CostEstimate(
            flops=flops, transcendentals=0, bytes_accessed=bytes_accessed),
    )(*inputs)

    # sample_and_group_all: new_xyz = zeros[B, 1, 3]; module then permutes -> [B, 3, 1]
    new_xyz = jnp.zeros((B, 3, 1), dtype=xyz.dtype)
    Qmatrix = jnp.array(0, dtype=jnp.int32)
    return new_xyz, new_points, Qmatrix


# ----------------------------------------------------------------------------- params


def init_raw_params(key, in_channel, mlp):
    """Deterministic Conv2d(1x1) + BatchNorm2d (eval) parameters, torch layout."""
    raw = []
    last = in_channel
    for out_ch in mlp:
        key, k1, k2, k3, k4, k5, k6 = jax.random.split(key, 7)
        w = jax.random.normal(k1, (out_ch, last), dtype=jnp.float32) * 0.1
        b = jax.random.normal(k2, (out_ch,), dtype=jnp.float32) * 0.1
        gamma = jax.random.uniform(k3, (out_ch,), minval=0.5, maxval=1.5)
        beta = jax.random.normal(k4, (out_ch,), dtype=jnp.float32) * 0.1
        mean = jax.random.normal(k5, (out_ch,), dtype=jnp.float32) * 0.1
        var = jax.random.uniform(k6, (out_ch,), minval=0.5, maxval=1.5)
        raw.append((w, b, gamma, beta, mean, var))
        last = out_ch
    return raw


def fold_params(raw_params, eps=1e-5):
    """Fold Conv bias + eval-mode BatchNorm into (W', b') for the kernel."""
    folded = []
    for (w, b, gamma, beta, mean, var) in raw_params:
        scale = gamma / jnp.sqrt(var + eps)
        Wf = w * scale[:, None]
        bf = ((b - mean) * scale + beta)[:, None]
        folded.append((Wf.astype(jnp.float32), bf.astype(jnp.float32)))
    return folded


def reference_forward(xyz, points, raw_params, eps=1e-5):
    """Pure-JAX reference of the torch forward (group_all=True, eval BN)."""
    h = jnp.transpose(xyz, (0, 2, 1))                       # [B, N, 3]
    if points is not None:
        h = jnp.concatenate([h, jnp.transpose(points, (0, 2, 1))], axis=-1)
    for (w, b, gamma, beta, mean, var) in raw_params:
        y = jnp.einsum("bnc,oc->bno", h, w,
                       precision=jax.lax.Precision.HIGHEST) + b
        y = (y - mean) / jnp.sqrt(var + eps) * gamma + beta
        h = jnp.maximum(y, 0.0)
    return jnp.max(h, axis=1)[:, :, None]                   # [B, Clast, 1]


# ----------------------------------------------------------------------------- main


if __name__ == "__main__":
    B, N, D = 2, 16, 4        # small shapes: batch=2, 16 points, 4 extra feature channels
    mlp = [32, 64]            # PointNetSetAbstraction(mlp=[32, 64], group_all=True)
    in_channel = 3 + D

    key = jax.random.PRNGKey(0)
    kx, kp, kw = jax.random.split(key, 3)
    xyz = jax.random.normal(kx, (B, 3, N), dtype=jnp.float32)      # [B, 3, N]
    points = jax.random.normal(kp, (B, D, N), dtype=jnp.float32)   # [B, D, N]
    raw_params = init_raw_params(kw, in_channel, mlp)
    folded = fold_params(raw_params)

    ref = reference_forward(xyz, points, raw_params)

    # f32 path (exact-ish check)
    new_xyz, new_points, Qmatrix = pointnet_set_abstraction_group_all(
        xyz, points, folded, use_bf16_matmul=False)
    jax.block_until_ready((new_xyz, new_points, Qmatrix))
    assert new_xyz.shape == (B, 3, 1)
    assert new_points.shape == (B, mlp[-1], 1)
    if not jnp.allclose(new_points, ref, rtol=5e-3, atol=5e-3):
        raise AssertionError(
            f"f32 path mismatch: max abs err = "
            f"{float(jnp.max(jnp.abs(new_points - ref)))}")

    # default bf16-MXU path (looser tolerance for bf16 rounding)
    _, new_points_bf16, _ = pointnet_set_abstraction_group_all(xyz, points, folded)
    jax.block_until_ready(new_points_bf16)
    if not jnp.allclose(new_points_bf16, ref, rtol=3e-2, atol=3e-2):
        raise AssertionError(
            f"bf16 path mismatch: max abs err = "
            f"{float(jnp.max(jnp.abs(new_points_bf16 - ref)))}")

    print("KERNEL_OK")
</pallas_src>

<mosaic_0001>
module attributes {stable_mosaic.version = 11 : i64} {
  func.func @kernel(%arg0: i32, %arg1: i32, %arg2: memref<1x3x128xf32, #tpu.memory_space<vmem>>, %arg3: memref<1x4x128xf32, #tpu.memory_space<vmem>>, %arg4: memref<32x3xf32, #tpu.memory_space<vmem>>, %arg5: memref<32x4xf32, #tpu.memory_space<vmem>>, %arg6: memref<32x1xf32, #tpu.memory_space<vmem>>, %arg7: memref<64x32xf32, #tpu.memory_space<vmem>>, %arg8: memref<64x1xf32, #tpu.memory_space<vmem>>, %arg9: memref<1x64x1xf32, #tpu.memory_space<vmem>>, %arg10: memref<64x128xf32, #tpu.memory_space<vmem>>) attributes {dimension_semantics = [#tpu.dimension_semantics<parallel>, #tpu.dimension_semantics<arbitrary>], iteration_bounds = array<i64: 2, 1>, scalar_prefetch = 0 : i64, scratch_operands = 1 : i64, tpu.core_type = #tpu.core_type<tc>, window_params = [{transform_indices = @transform_0, window_bounds = array<i64: 1, 3, 128>}, {transform_indices = @transform_1, window_bounds = array<i64: 1, 4, 128>}, {pipeline_mode = #tpu.pipeline_mode<synchronous>, transform_indices = @transform_2, window_bounds = array<i64: 32, 3>}, {pipeline_mode = #tpu.pipeline_mode<synchronous>, transform_indices = @transform_3, window_bounds = array<i64: 32, 4>}, {pipeline_mode = #tpu.pipeline_mode<synchronous>, transform_indices = @transform_4, window_bounds = array<i64: 32, 1>}, {pipeline_mode = #tpu.pipeline_mode<synchronous>, transform_indices = @transform_5, window_bounds = array<i64: 64, 32>}, {pipeline_mode = #tpu.pipeline_mode<synchronous>, transform_indices = @transform_6, window_bounds = array<i64: 64, 1>}, {transform_indices = @transform_7, window_bounds = array<i64: 1, 64, 1>}]} {
    %c0 = arith.constant 0 : index
    %c0_0 = arith.constant 0 : index
    %0 = vector.load %arg4[%c0, %c0_0] : memref<32x3xf32, #tpu.memory_space<vmem>>, vector<32x3xf32>
    %c0_1 = arith.constant 0 : index
    %c0_2 = arith.constant 0 : index
    %1 = vector.load %arg5[%c0_1, %c0_2] : memref<32x4xf32, #tpu.memory_space<vmem>>, vector<32x4xf32>
    %c0_3 = arith.constant 0 : index
    %c0_4 = arith.constant 0 : index
    %2 = vector.load %arg6[%c0_3, %c0_4] : memref<32x1xf32, #tpu.memory_space<vmem>>, vector<32x1xf32>
    %c0_5 = arith.constant 0 : index
    %c0_6 = arith.constant 0 : index
    %c0_7 = arith.constant 0 : index
    %3 = vector.load %arg2[%c0_5, %c0_6, %c0_7] : memref<1x3x128xf32, #tpu.memory_space<vmem>>, vector<1x3x128xf32>
    %4 = vector.shape_cast %3 : vector<1x3x128xf32> to vector<3x128xf32>
    %5 = vector.extract_strided_slice %0 {offsets = [0, 0], sizes = [32, 1], strides = [1, 1]} : vector<32x3xf32> to vector<32x1xf32>
    %6 = vector.extract_strided_slice %4 {offsets = [0, 0], sizes = [1, 128], strides = [1, 1]} : vector<3x128xf32> to vector<1x128xf32>
    %7 = vector.broadcast %5 : vector<32x1xf32> to vector<32x128xf32>
    %8 = vector.broadcast %6 : vector<1x128xf32> to vector<32x128xf32>
    %9 = arith.mulf %7, %8 : vector<32x128xf32>
    %10 = vector.extract_strided_slice %0 {offsets = [0, 1], sizes = [32, 1], strides = [1, 1]} : vector<32x3xf32> to vector<32x1xf32>
    %11 = vector.extract_strided_slice %4 {offsets = [1, 0], sizes = [1, 128], strides = [1, 1]} : vector<3x128xf32> to vector<1x128xf32>
    %12 = vector.broadcast %10 : vector<32x1xf32> to vector<32x128xf32>
    %13 = vector.broadcast %11 : vector<1x128xf32> to vector<32x128xf32>
    %14 = arith.mulf %12, %13 : vector<32x128xf32>
    %15 = arith.addf %9, %14 : vector<32x128xf32>
    %16 = vector.extract_strided_slice %0 {offsets = [0, 2], sizes = [32, 1], strides = [1, 1]} : vector<32x3xf32> to vector<32x1xf32>
    %17 = vector.extract_strided_slice %4 {offsets = [2, 0], sizes = [1, 128], strides = [1, 1]} : vector<3x128xf32> to vector<1x128xf32>
    %18 = vector.broadcast %16 : vector<32x1xf32> to vector<32x128xf32>
    %19 = vector.broadcast %17 : vector<1x128xf32> to vector<32x128xf32>
    %20 = arith.mulf %18, %19 : vector<32x128xf32>
    %21 = arith.addf %15, %20 : vector<32x128xf32>
    %c0_8 = arith.constant 0 : index
    %c0_9 = arith.constant 0 : index
    %c0_10 = arith.constant 0 : index
    %22 = vector.load %arg3[%c0_8, %c0_9, %c0_10] : memref<1x4x128xf32, #tpu.memory_space<vmem>>, vector<1x4x128xf32>
    %23 = vector.shape_cast %22 : vector<1x4x128xf32> to vector<4x128xf32>
    %24 = vector.extract_strided_slice %1 {offsets = [0, 0], sizes = [32, 1], strides = [1, 1]} : vector<32x4xf32> to vector<32x1xf32>
    %25 = vector.extract_strided_slice %23 {offsets = [0, 0], sizes = [1, 128], strides = [1, 1]} : vector<4x128xf32> to vector<1x128xf32>
    %26 = vector.broadcast %24 : vector<32x1xf32> to vector<32x128xf32>
    %27 = vector.broadcast %25 : vector<1x128xf32> to vector<32x128xf32>
    %28 = arith.mulf %26, %27 : vector<32x128xf32>
    %29 = arith.addf %21, %28 : vector<32x128xf32>
    %30 = vector.extract_strided_slice %1 {offsets = [0, 1], sizes = [32, 1], strides = [1, 1]} : vector<32x4xf32> to vector<32x1xf32>
    %31 = vector.extract_strided_slice %23 {offsets = [1, 0], sizes = [1, 128], strides = [1, 1]} : vector<4x128xf32> to vector<1x128xf32>
    %32 = vector.broadcast %30 : vector<32x1xf32> to vector<32x128xf32>
    %33 = vector.broadcast %31 : vector<1x128xf32> to vector<32x128xf32>
    %34 = arith.mulf %32, %33 : vector<32x128xf32>
    %35 = arith.addf %29, %34 : vector<32x128xf32>
    %36 = vector.extract_strided_slice %1 {offsets = [0, 2], sizes = [32, 1], strides = [1, 1]} : vector<32x4xf32> to vector<32x1xf32>
    %37 = vector.extract_strided_slice %23 {offsets = [2, 0], sizes = [1, 128], strides = [1, 1]} : vector<4x128xf32> to vector<1x128xf32>
    %38 = vector.broadcast %36 : vector<32x1xf32> to vector<32x128xf32>
    %39 = vector.broadcast %37 : vector<1x128xf32> to vector<32x128xf32>
    %40 = arith.mulf %38, %39 : vector<32x128xf32>
    %41 = arith.addf %35, %40 : vector<32x128xf32>
    %42 = vector.extract_strided_slice %1 {offsets = [0, 3], sizes = [32, 1], strides = [1, 1]} : vector<32x4xf32> to vector<32x1xf32>
    %43 = vector.extract_strided_slice %23 {offsets = [3, 0], sizes = [1, 128], strides = [1, 1]} : vector<4x128xf32> to vector<1x128xf32>
    %44 = vector.broadcast %42 : vector<32x1xf32> to vector<32x128xf32>
    %45 = vector.broadcast %43 : vector<1x128xf32> to vector<32x128xf32>
    %46 = arith.mulf %44, %45 : vector<32x128xf32>
    %47 = arith.addf %41, %46 : vector<32x128xf32>
    %48 = vector.broadcast %2 : vector<32x1xf32> to vector<32x128xf32>
    %49 = arith.addf %47, %48 : vector<32x128xf32>
    %cst = arith.constant 0.000000e+00 : f32
    %50 = vector.broadcast %cst : f32 to vector<32x128xf32>
    %51 = arith.maximumf %49, %50 : vector<32x128xf32>
    %c0_11 = arith.constant 0 : index
    %c0_12 = arith.constant 0 : index
    %52 = vector.load %arg7[%c0_11, %c0_12] : memref<64x32xf32, #tpu.memory_space<vmem>>, vector<64x32xf32>
    %c0_13 = arith.constant 0 : index
    %c0_14 = arith.constant 0 : index
    %53 = vector.load %arg8[%c0_13, %c0_14] : memref<64x1xf32, #tpu.memory_space<vmem>>, vector<64x1xf32>
    %cst_15 = arith.constant dense<0.000000e+00> : vector<64x128xf32>
    %54 = tpu.matmul %52, %51, %cst_15 {dimension_numbers = #tpu.dot_dimension_numbers<[1], [0], [0], [1], [0, 0, 1, 1], [], []>} : vector<64x32xf32>, vector<32x128xf32>, vector<64x128xf32> -> vector<64x128xf32>
    %55 = vector.broadcast %53 : vector<64x1xf32> to vector<64x128xf32>
    %56 = arith.addf %54, %55 : vector<64x128xf32>
    %cst_16 = arith.constant 0.000000e+00 : f32
    %57 = vector.broadcast %cst_16 : f32 to vector<64x128xf32>
    %58 = arith.maximumf %56, %57 : vector<64x128xf32>
    %59 = tpu.iota {dimensions = array<i32: 1>} : vector<1x128xi32>
    %c128_i32 = arith.constant 128 : i32
    %60 = arith.muli %arg1, %c128_i32 : i32
    %61 = vector.broadcast %60 : i32 to vector<1x128xi32>
    %62 = arith.addi %59, %61 : vector<1x128xi32>
    %c16_i32 = arith.constant 16 : i32
    %63 = vector.broadcast %c16_i32 : i32 to vector<1x128xi32>
    %64 = arith.cmpi slt, %62, %63 : vector<1x128xi32>
    %cst_17 = arith.constant 0.000000e+00 : f32
    %65 = vector.shape_cast %64 : vector<1x128xi1> to vector<1x128xi1>
    %66 = vector.broadcast %65 : vector<1x128xi1> to vector<64x128xi1>
    %67 = vector.broadcast %cst_17 : f32 to vector<64x128xf32>
    %68 = arith.select %66, %58, %67 : vector<64x128xi1>, vector<64x128xf32>
    %c0_i32 = arith.constant 0 : i32
    %69 = arith.cmpi eq, %arg1, %c0_i32 : i32
    %70 = arith.extui %69 : i1 to i32
    %c0_i32_18 = arith.constant 0 : i32
    %71 = arith.cmpi ne, %70, %c0_i32_18 : i32
    scf.if %71 {
      %cst_25 = arith.constant 0.000000e+00 : f32
      %78 = vector.broadcast %cst_25 : f32 to vector<64x128xf32>
      %c0_26 = arith.constant 0 : index
      %c0_27 = arith.constant 0 : index
      %79 = vector.load %arg10[%c0_26, %c0_27] : memref<64x128xf32, #tpu.memory_space<vmem>>, vector<64x128xf32>
      tpu.vector_store %arg10[%c0_26, %c0_27], %78 {strides = array<i32>} : memref<64x128xf32, #tpu.memory_space<vmem>>, vector<64x128xf32>,
    } else {
    }
    %c0_19 = arith.constant 0 : index
    %c0_20 = arith.constant 0 : index
    %72 = vector.load %arg10[%c0_19, %c0_20] : memref<64x128xf32, #tpu.memory_space<vmem>>, vector<64x128xf32>
    %73 = arith.maximumf %72, %68 : vector<64x128xf32>
    %c0_21 = arith.constant 0 : index
    %c0_22 = arith.constant 0 : index
    %74 = vector.load %arg10[%c0_21, %c0_22] : memref<64x128xf32, #tpu.memory_space<vmem>>, vector<64x128xf32>
    tpu.vector_store %arg10[%c0_21, %c0_22], %73 {strides = array<i32>} : memref<64x128xf32, #tpu.memory_space<vmem>>, vector<64x128xf32>,
    %c0_i32_23 = arith.constant 0 : i32
    %75 = arith.cmpi eq, %arg1, %c0_i32_23 : i32
    %76 = arith.extui %75 : i1 to i32
    %c0_i32_24 = arith.constant 0 : i32
    %77 = arith.cmpi ne, %76, %c0_i32_24 : i32
    scf.if %77 {
      %c0_25 = arith.constant 0 : index
      %c0_26 = arith.constant 0 : index
      %78 = vector.load %arg10[%c0_25, %c0_26] : memref<64x128xf32, #tpu.memory_space<vmem>>, vector<64x128xf32>
      %cst_27 = arith.constant dense<0xFF800000> : vector<64xf32>
      %79 = vector.multi_reduction <maximumf>, %78, %cst_27 [1] : vector<64x128xf32> to vector<64xf32>
      %80 = vector.shape_cast %79 : vector<64xf32> to vector<64x1xf32>
      %c0_28 = arith.constant 0 : index
      %c0_29 = arith.constant 0 : index
      %c0_30 = arith.constant 0 : index
      %81 = vector.load %arg9[%c0_28, %c0_29, %c0_30] : memref<1x64x1xf32, #tpu.memory_space<vmem>>, vector<1x64x1xf32>
      %82 = vector.shape_cast %81 : vector<1x64x1xf32> to vector<64x1xf32>
      %83 = vector.shape_cast %80 : vector<64x1xf32> to vector<1x64x1xf32>
      tpu.vector_store %arg9[%c0_28, %c0_29, %c0_30], %83 {strides = array<i32>} : memref<1x64x1xf32, #tpu.memory_space<vmem>>, vector<1x64x1xf32>,
    } else {
    }
    return
  }
  func.func @transform_0(%arg0: i32, %arg1: i32) -> (i32, i32, i32) {
    %c0_i32 = arith.constant 0 : i32
    %c0_i32_0 = arith.constant 0 : i32
    return %arg0, %c0_i32, %arg1 : i32, i32, i32
  }
  func.func @transform_1(%arg0: i32, %arg1: i32) -> (i32, i32, i32) {
    %c0_i32 = arith.constant 0 : i32
    %c0_i32_0 = arith.constant 0 : i32
    return %arg0, %c0_i32, %arg1 : i32, i32, i32
  }
  func.func @transform_2(%arg0: i32, %arg1: i32) -> (i32, i32) {
    %c0_i32 = arith.constant 0 : i32
    %c0_i32_0 = arith.constant 0 : i32
    %c0_i32_1 = arith.constant 0 : i32
    return %c0_i32, %c0_i32_0 : i32, i32
  }
  func.func @transform_3(%arg0: i32, %arg1: i32) -> (i32, i32) {
    %c0_i32 = arith.constant 0 : i32
    %c0_i32_0 = arith.constant 0 : i32
    %c0_i32_1 = arith.constant 0 : i32
    return %c0_i32, %c0_i32_0 : i32, i32
  }
  func.func @transform_4(%arg0: i32, %arg1: i32) -> (i32, i32) {
    %c0_i32 = arith.constant 0 : i32
    %c0_i32_0 = arith.constant 0 : i32
    %c0_i32_1 = arith.constant 0 : i32
    return %c0_i32, %c0_i32_0 : i32, i32
  }
  func.func @transform_5(%arg0: i32, %arg1: i32) -> (i32, i32) {
    %c0_i32 = arith.constant 0 : i32
    %c0_i32_0 = arith.constant 0 : i32
    %c0_i32_1 = arith.constant 0 : i32
    return %c0_i32, %c0_i32_0 : i32, i32
  }
  func.func @transform_6(%arg0: i32, %arg1: i32) -> (i32, i32) {
    %c0_i32 = arith.constant 0 : i32
    %c0_i32_0 = arith.constant 0 : i32
    %c0_i32_1 = arith.constant 0 : i32
    return %c0_i32, %c0_i32_0 : i32, i32
  }
  func.func @transform_7(%arg0: i32, %arg1: i32) -> (i32, i32, i32) {
    %c0_i32 = arith.constant 0 : i32
    %c0_i32_0 = arith.constant 0 : i32
    %c0_i32_1 = arith.constant 0 : i32
    return %arg0, %c0_i32, %c0_i32_0 : i32, i32, i32
  }
}

</mosaic_0001>

<bundles_post_ra>
// kernel: tpu_custom_call.1
= control target key start
LH: loop header
LB: loop body
LE: loop exit
PB: predicated region body
PF: predicated region fallthrough
CT: control target
= control target key end

     0   :  { %s1111_s24 = smov 0   ;;  %s1113_s25 = smov 0   ;;  %s1271_s0 = inlined_call_operand.vmem [shape: f32[2,3,128], index: 0, kind: input, shape index: {}]   ;;  %s1272_s1 = inlined_call_operand.vmem [shape: f32[2,4,128], index: 1, kind: input, shape index: {}]   ;;  %s1273_s2 = inlined_call_operand.vmem [shape: f32[32,3], index: 2, kind: input, shape index: {}]   ;;  %s1274_s3 = inlined_call_operand.vmem [shape: f32[32,4], index: 3, kind: input, shape index: {}]   ;;  %s1275_s4 = inlined_call_operand.vmem [shape: f32[32,1], index: 4, kind: input, shape index: {}]   ;;  %s1276_s5 = inlined_call_operand.vmem [shape: f32[64,32], index: 5, kind: input, shape index: {}]   ;;  %s1277_s6 = inlined_call_operand.vmem [shape: f32[64,1], index: 6, kind: input, shape index: {}]   ;;  %s1278_s7 = inlined_call_operand.vmem [shape: f32[2,64,1], index: 7, kind: output, shape index: {}]  }
   0x1   :  { %s1115_s26 = smov 0  }
   0x2 LB: > { %s29_s27 = sadd.s32 1, %s1061_s25  ;;  %p936_p0 = scmp.ge.s32.totalorder %s1065_s26, 1  ;;  %s1065_s26 = sphi %s1115_s26, %s17_s26   ;;  %s1061_s25 = sphi %s1113_s25, %s1280_s25   ;;  %s1057_s24 = sphi %s1111_s24, %s1279_s24  }
   0x3   : > { %p31_p1 = scmp.ge.s32.totalorder %s29_s27, 2  ;;  %p267_p2 = scmp.lt.s32.totalorder %s1065_s26, 3 }
   0x5   : > { %s1282_s27 = smov (%p31_p1, %s29_s27), 0  ;;  %p268_p3 = pnand %p936_p0, %p267_p2 }
   0x6   : > { %v327_v0 = vld [vmem:[%s1273_s2] sm:$0xff] (!%p268_p3)  ;;  %v1067_v1 = vmov (!%p268_p3), 1   ;;  %v1068_v2 = vmov (!%p268_p3), 0   ;;  %v328_v3 = vld [vmem:[%s1273_s2 + $0x8] sm:$0xff] (!%p268_p3)  ;;  %v330_v4 = vld [vmem:[%s1273_s2 + $0x18] sm:$0xff] (!%p268_p3)  ;;  %v1069_v5 = vmov (!%p268_p3), 2   ;;  %v360_v41 = vlaneseq (!%p268_p3) }
   0x7   : > { %271 = sbr.rel (%p268_p3) target bundleno = 609 (0x261), region = 48  ;;  %1025 = vset.pattern.permute.xlu1 (!%p268_p3), %v1067_v1  ;;  %1024 = vset.pattern.permute.xlu0 (!%p268_p3), %v1068_v2  ;;  %v331_v6 = vld [vmem:[%s1274_s3] sm:$0xff] (!%p268_p3)  ;;  %v329_v7 = vld [vmem:[%s1273_s2 + $0x10] sm:$0xff] (!%p268_p3)  ;;  %v332_v8 = vld [vmem:[%s1274_s3 + $0x8] sm:$0xff] (!%p268_p3)  ;;  %v1070_v11 = vmov (!%p268_p3), 3   ;;  %vm625_vm0 = vcmask (!%p268_p3), 261120  }
   0x8   : > { %369 = vperm.xlu1 (!%p268_p3), %1025, %v327_v0   ;;  %342 = vperm.xlu0 (!%p268_p3), %1024, %v327_v0   ;;  %v334_v9 = vld [vmem:[%s1274_s3 + $0x18] sm:$0xff] (!%p268_p3)  ;;  %v333_v10 = vld [vmem:[%s1274_s3 + $0x10] sm:$0xff] (!%p268_p3)  ;;  %v578_v13 = vld [vmem:[%s1277_s6 + $0x8] sm:$0xff] (!%p268_p3)  ;;  %p308_p4 = scmp.lt.s32.totalorder (!%p268_p3), %s1057_s24, 1  ;;  %v361_v43 = vshrl.u32 (!%p268_p3), %v360_v41, 7  ;;  %vm842_vm2 = vcmask (!%p268_p3), 7168  }
   0x9   : > { %v337_v12 = vld [vmem:[%s1275_s4 + $0x10] sm:$0xff] (!%p268_p3)  ;;  %v580_v14 = vld [vmem:[%s1277_s6 + $0x18] sm:$0xff] (!%p268_p3)  ;;  %v582_v15 = vld [vmem:[%s1277_s6 + $0x28] sm:$0xff] (!%p268_p3) }
   0xa   : > { %v584_v16 = vld [vmem:[%s1277_s6 + $0x38] sm:$0xff] (!%p268_p3)  ;;  %v335_v17 = vld [vmem:[%s1275_s4] sm:$0xff] (!%p268_p3)  ;;  %v336_v18 = vld [vmem:[%s1275_s4 + $0x8] sm:$0xff] (!%p268_p3)  ;;  %v386_v46 = vsub.s32 (!%p268_p3), 1, %v361_v43  ;;  %v362_v47 = vsub.s32 (!%p268_p3), 0, %v361_v43  ;;  %v414_v52 = vsub.s32 (!%p268_p3), 2, %v361_v43 }
   0xb   : > { %v338_v19 = vld [vmem:[%s1275_s4 + $0x18] sm:$0xff] (!%p268_p3)  ;;  %v577_v20 = vld [vmem:[%s1277_s6] sm:$0xff] (!%p268_p3)  ;;  %v579_v21 = vld [vmem:[%s1277_s6 + $0x10] sm:$0xff] (!%p268_p3) }
   0xc   : > { %373 = vperm.xlu1 (!%p268_p3), %1025, %v328_v3   ;;  %347 = vperm.xlu0 (!%p268_p3), %1024, %v328_v3   ;;  %v569_v22 = vld [vmem:[%s1276_s5] sm:$0xff] (!%p268_p3)  ;;  %v583_v25 = vld [vmem:[%s1277_s6 + $0x30] sm:$0xff] (!%p268_p3) }
   0xd   : > { %v573_v23 = vld [vmem:[%s1276_s5 + $0x20] sm:$0xff] (!%p268_p3)  ;;  %972 = vmatprep.mubr.msk.f32.mxu0 (!%p268_p3), %vm625_vm0, %v569_v22 }
   0xe   : > { %v581_v24 = vld [vmem:[%s1277_s6 + $0x20] sm:$0xff]  ;;  %978 = vmatprep.mubr.msk.f32.mxu1 %vm625_vm0, %v573_v23  ;;  %s1284_s24 = smov (!%p308_p4, %s1057_s24), 1 }
   0xf   : > { %s937_s11 = sshll.u32 %s1284_s24, 2 }
  0x10   : > { %1026 = vset.pattern.permute.xlu1 %v1069_v5  ;;  %357 = vperm.xlu0 %1024, %v330_v4   ;;  %s314_s14 = scalar_lea.vmem %s1271_s0, %s937_s11  ;;  %s321_s17 = scalar_lea.vmem %s1272_s1, %s937_s11 }
  0x11   : > { %401 = vperm.xlu1 %1026, %v328_v3   ;;  %v339_v48 = vld [vmem:[%s314_s14] sm:$0x7]  ;;  %s951_s11 = sshll.u32 %s1284_s24, 6 }
  0x12   : > { %v387_v50 = vrot.slane %v339_v48, %v386_v46  ;;  %v363_v51 = vrot.slane %v339_v48, %v362_v47  ;;  %v424_v55 = vld [vmem:[%s321_s17] sm:$0xf]  ;;  %v415_v58 = vrot.slane %v339_v48, %v414_v52  ;;  %s326_s14 = scalar_lea.vmem %s1278_s7, %s951_s11 }
  0x13   : > { %v448_v59 = vrot.slane %v424_v55, %v362_v47 }
  0x14   : > { %427 = vperm.xlu0 %1024, %v331_v6  }
  0x15   : > { %1027 = vset.pattern.permute.xlu1 %v1068_v2 }
  0x16   : > { %352 = vperm.xlu1 %1027, %v329_v7  }
  0x18   : > { %1032 = vset.pattern.permute.xlu0 %v1067_v1 }
  0x19   : > { %462 = vperm.xlu0 %1032, %v332_v8  }
  0x1a   : > { %1028 = vset.pattern.permute.xlu1 %v1067_v1 }
  0x1b   : > { %377 = vperm.xlu1 %1028, %v329_v7  }
  0x1d   : > { %470 = vperm.xlu0 %1032, %v334_v9  }
  0x1f   : > { %381 = vperm.xlu1 %1028, %v330_v4  }
  0x21   : > { %1036 = vset.pattern.permute.xlu0 %v1069_v5 }
  0x22   : > { %397 = vperm.xlu0 %1036, %v327_v0  }
  0x23   : > { %1029 = vset.pattern.permute.xlu1 %v1068_v2 }
  0x24   : > { %432 = vperm.xlu1 %1029, %v332_v8  }
  0x26   : > { %405 = vperm.xlu0 %1036, %v329_v7   ;;  %v531_v7 = vsub.s32 3, %v361_v43 }
  0x28   : > { %1030 = vset.pattern.permute.xlu1 %v1069_v5  ;;  %v532_v23 = vrot.slane %v424_v55, %v531_v7 }
  0x29   : > { %409 = vperm.xlu1 %1030, %v330_v4  }
  0x2a   : > { %486 = vperm.xlu0 %1036, %v331_v6  }
  0x2d   : > { %1031 = vset.pattern.permute.xlu1 %v1067_v1 }
  0x2e   : > { %458 = vperm.xlu1 %1031, %v331_v6   ;;  %494 = vperm.xlu0 %1036, %v333_v10  }
  0x32   : > { %1033 = vset.pattern.permute.xlu1 %v1068_v2  ;;  %1040 = vset.pattern.permute.xlu0 %v1070_v11 }
  0x33   : > { %437 = vperm.xlu1 %1033, %v333_v10   ;;  %526 = vperm.xlu0 %1040, %v334_v9  }
  0x37   : > { %442 = vperm.xlu1 %1033, %v334_v9   ;;  %1042 = vset.pattern.permute.xlu0 %v1068_v2 }
  0x38   : > { %553 = vperm.xlu0 %1042, %v337_v12  }
  0x3b   : > { %1034 = vset.pattern.permute.xlu1 %v1069_v5 }
  0x3c   : > { %490 = vperm.xlu1 %1034, %v332_v8   ;;  %592 = vperm.xlu0 %1042, %v578_v13  }
  0x40   : > { %1035 = vset.pattern.permute.xlu1 %v1067_v1  ;;  %602 = vperm.xlu0 %1042, %v580_v14  }
  0x41   : > { %466 = vperm.xlu1 %1035, %v333_v10  }
  0x44   : > { %612 = vperm.xlu0 %1042, %v582_v15   ;;  %v504_v15 = vrot.slane %v424_v55, %v414_v52 }
  0x45   : > { %1037 = vset.pattern.permute.xlu1 %v1070_v11 }
  0x46   : > { %514 = vperm.xlu1 %1037, %v331_v6  }
  0x48   : > { %622 = vperm.xlu0 %1042, %v584_v16  }
  0x4a   : > { %518 = vperm.xlu1 %1037, %v332_v8  }
  0x4e   : > { %1038 = vset.pattern.permute.xlu1 %v1069_v5 }
  0x4f   : > { %498 = vperm.xlu1 %1038, %v334_v9  }
  0x53   : > { %1039 = vset.pattern.permute.xlu1 %v1070_v11 }
  0x54   : > { %522 = vperm.xlu1 %1039, %v333_v10  }
  0x58   : > { %1041 = vset.pattern.permute.xlu1 %v1068_v2  ;;  %v476_v2 = vrot.slane %v424_v55, %v386_v46 }
  0x59   : > { %543 = vperm.xlu1 %1041, %v335_v17  }
  0x5d   : > { %548 = vperm.xlu1 %1041, %v336_v18  }
  0x61   : > { %558 = vperm.xlu1 %1041, %v338_v19  }
  0x65   : > { %587 = vperm.xlu1 %1041, %v577_v20  }
  0x69   : > { %597 = vperm.xlu1 %1041, %v579_v21  }
  0x6d   : > { %607 = vperm.xlu1 %1041, %v581_v24  }
  0x71   : > { %617 = vperm.xlu1 %1041, %v583_v25  }
  0x87   : > { %v370_v26 = vpop.permute.xlu1 %369  ;;  %v343_v32 = vpop.permute.xlu0 %342 }
  0x88   : > { %v388_v56 = vmul.f32 %v387_v50, %v370_v26  ;;  %v364_v57 = vmul.f32 %v363_v51, %v343_v32 }
  0x8a   : > { %v392_v1 = vadd.f32 %v388_v56, %v364_v57 }
  0x8b   : > { %v374_v27 = vpop.permute.xlu1 %373  ;;  %v348_v34 = vpop.permute.xlu0 %347 }
  0x8c   : > { %v389_v63 = vmul.f32 %v387_v50, %v374_v27  ;;  %v365_v0 = vmul.f32 %v363_v51, %v348_v34 }
  0x8e   : > { %v393_v13 = vadd.f32 %v389_v63, %v365_v0 }
  0x8f   : > { %v358_v36 = vpop.permute.xlu0 %357 }
  0x90   : > { %v402_v28 = vpop.permute.xlu1 %401  ;;  %v367_v5 = vmul.f32 %v363_v51, %v358_v36 }
  0x91   : > { %v417_v4 = vmul.f32 %v415_v58, %v402_v28 }
  0x93   : > { %v428_v38 = vpop.permute.xlu0 %427  ;;  %v421_v21 = vadd.f32 %v417_v4, %v393_v13  ;;  %v576_v13 = vld [vmem:[%s1276_s5 + $0x38] sm:$0xff] }
  0x94   : > { %v449_v9 = vmul.f32 %v448_v59, %v428_v38 }
  0x95   : > { %v353_v29 = vpop.permute.xlu1 %352 }
  0x96   : > { %v366_v8 = vmul.f32 %v363_v51, %v353_v29 }
  0x98   : > { %v463_v42 = vpop.permute.xlu0 %462 }
  0x99   : > { %v478_v29 = vmul.f32 %v476_v2, %v463_v42 }
  0x9a   : > { %v378_v30 = vpop.permute.xlu1 %377 }
  0x9b   : > { %v390_v3 = vmul.f32 %v387_v50, %v378_v30 }
  0x9c   : > { %v471_v45 = vpop.permute.xlu0 %470 }
  0x9d   : > { %v394_v17 = vadd.f32 %v390_v3, %v366_v8  ;;  %v480_v38 = vmul.f32 %v476_v2, %v471_v45  ;;  %v570_v8 = vld [vmem:[%s1276_s5 + $0x8] sm:$0xff] }
  0x9e   : > { %v382_v31 = vpop.permute.xlu1 %381 }
  0x9f   : > { %v391_v6 = vmul.f32 %v387_v50, %v382_v31 }
  0xa1   : > { %v398_v53 = vpop.permute.xlu0 %397  ;;  %v395_v22 = vadd.f32 %v391_v6, %v367_v5 }
  0xa2   : > { %v416_v60 = vmul.f32 %v415_v58, %v398_v53 }
  0xa3   : > { %v433_v33 = vpop.permute.xlu1 %432 }
  0xa4   : > { %v420_v10 = vadd.f32 %v416_v60, %v392_v1  ;;  %v450_v14 = vmul.f32 %v448_v59, %v433_v33 }
  0xa5   : > { %v406_v61 = vpop.permute.xlu0 %405 }
  0xa6   : > { %v418_v11 = vmul.f32 %v415_v58, %v406_v61  ;;  %v453_v25 = vadd.f32 %v449_v9, %v420_v10  ;;  %v454_v30 = vadd.f32 %v450_v14, %v421_v21  ;;  %v574_v9 = vld [vmem:[%s1276_s5 + $0x28] sm:$0xff]  ;;  %v571_v10 = vld [vmem:[%s1276_s5 + $0x10] sm:$0xff] }
  0xa8   : > { %v410_v35 = vpop.permute.xlu1 %409  ;;  %v422_v24 = vadd.f32 %v418_v11, %v394_v17  ;;  %v482_v47 = vadd.f32 %v478_v29, %v454_v30  ;;  %v575_v11 = vld [vmem:[%s1276_s5 + $0x30] sm:$0xff] }
  0xa9   : > { %v487_v12 = vpop.permute.xlu0 %486  ;;  %v419_v18 = vmul.f32 %v415_v58, %v410_v35 }
  0xaa   : > { %v505_v34 = vmul.f32 %v504_v15, %v487_v12  ;;  %v572_v12 = vld [vmem:[%s1276_s5 + $0x18] sm:$0xff] }
  0xab   : > { %v423_v31 = vadd.f32 %v419_v18, %v395_v22 }
  0xad   : > { %v459_v37 = vpop.permute.xlu1 %458  ;;  %v495_v28 = vpop.permute.xlu0 %494 }
  0xae   : > { %v477_v19 = vmul.f32 %v476_v2, %v459_v37  ;;  %v507_v43 = vmul.f32 %v504_v15, %v495_v28 }
  0xb0   : > { %v481_v32 = vadd.f32 %v477_v19, %v453_v25  ;;  %v764_v19 = vand.u32 127, %v360_v41 }
  0xb2   : > { %v438_v39 = vpop.permute.xlu1 %437  ;;  %v509_v48 = vadd.f32 %v505_v34, %v481_v32  ;;  %vm768_vm1 = vcmp.lt.s32.totalorder %v764_v19, 16 }
  0xb3   : > { %v451_v20 = vmul.f32 %v448_v59, %v438_v39 }
  0xb5   : > { %v455_v33 = vadd.f32 %v451_v20, %v422_v24 }
  0xb6   : > { %v443_v40 = vpop.permute.xlu1 %442 }
  0xb7   : > { %v452_v26 = vmul.f32 %v448_v59, %v443_v40 }
  0xb9   : > { %v456_v35 = vadd.f32 %v452_v26, %v423_v31 }
  0xbb   : > { %v491_v44 = vpop.permute.xlu1 %490  ;;  %v484_v55 = vadd.f32 %v480_v38, %v456_v35 }
  0xbc   : > { %v506_v37 = vmul.f32 %v504_v15, %v491_v44 }
  0xbe   : > { %v510_v42 = vadd.f32 %v506_v37, %v482_v47 }
  0xc0   : > { %v467_v49 = vpop.permute.xlu1 %466 }
  0xc1   : > { %v479_v27 = vmul.f32 %v476_v2, %v467_v49  ;;  %v527_v49 = vpop.permute.xlu0 %526 }
  0xc2   : > { %v536_v57 = vmul.f32 %v532_v23, %v527_v49 }
  0xc3   : > { %v483_v39 = vadd.f32 %v479_v27, %v455_v33 }
  0xc5   : > { %v515_v54 = vpop.permute.xlu1 %514  ;;  %v511_v53 = vadd.f32 %v507_v43, %v483_v39  ;;  %v554_v63 = vpop.permute.xlu0 %553 }
  0xc6   : > { %v533_v46 = vmul.f32 %v532_v23, %v515_v54 }
  0xc8   : > { %v537_v56 = vadd.f32 %v533_v46, %v509_v48 }
  0xc9   : > { %v519_v62 = vpop.permute.xlu1 %518  ;;  %v593_v14 = vpop.permute.xlu0 %592 }
  0xca   : > { %v534_v50 = vmul.f32 %v532_v23, %v519_v62 }
  0xcc   : > { %v538_v60 = vadd.f32 %v534_v50, %v510_v42 }
  0xce   : > { %v499_v16 = vpop.permute.xlu1 %498 }
  0xcf   : > { %v508_v51 = vmul.f32 %v504_v15, %v499_v16  ;;  %v603_v16 = vpop.permute.xlu0 %602 }
  0xd1   : > { %v512_v58 = vadd.f32 %v508_v51, %v484_v55 }
  0xd3   : > { %v523_v36 = vpop.permute.xlu1 %522  ;;  %v540_v62 = vadd.f32 %v536_v57, %v512_v58  ;;  %v613_v18 = vpop.permute.xlu0 %612 }
  0xd4   : > { %v535_v40 = vmul.f32 %v532_v23, %v523_v36 }
  0xd6   : > { %v539_v59 = vadd.f32 %v535_v40, %v511_v53 }
  0xd7   : > { %v623_v29 = vpop.permute.xlu0 %622 }
  0xd8   : > { %v544_v52 = vpop.permute.xlu1 %543  ;;  %v563_v54 = vadd.f32 %v554_v63, %v539_v59 }
  0xd9   : > { %v561_v45 = vadd.f32 %v544_v52, %v537_v56 }
  0xda   : > { %v567_v5 = vmax.f32 %v563_v54, 0.0 }
  0xdb   : > { %v565_v0 = vmax.f32 %v561_v45, 0.0 }
  0xdc   : > { %v549_v61 = vpop.permute.xlu1 %548 }
  0xdd   : > { %v562_v44 = vadd.f32 %v549_v61, %v538_v60 }
  0xdf   : > { %v566_v1 = vmax.f32 %v562_v44, 0.0 }
  0xe0   : > { %v559_v2 = vpop.permute.xlu1 %558 }
  0xe1   : > { %v984_v3 = vpack.c.bf16 %v566_v1, %v565_v0  ;;  %v564_v4 = vadd.f32 %v559_v2, %v540_v62 }
  0xe3   : > { %v568_v6 = vmax.f32 %v564_v4, 0.0  ;;  %985 = vmatprep.subr.bf16.mxu0 %v984_v3  ;;  %992 = vmatprep.subr.bf16.mxu1 %v984_v3 }
  0xe4   : > { %987 = vmatpush3.bf16.msra.mxu0 %v984_v3  ;;  %994 = vmatpush3.bf16.msra.mxu1 %v984_v3  ;;  %v588_v15 = vpop.permute.xlu1 %587 }
  0xe5   : > { %v988_v7 = vpack.c.bf16 %v568_v6, %v567_v5 }
  0xe7   : > { %989 = vmatprep.subr.bf16.mxu0 %v988_v7  ;;  %993 = vmatprep.subr.bf16.mxu1 %v988_v7 }
  0xe8   : > { %991 = vmatpush3.bf16.msra.mxu0 %v988_v7  ;;  %995 = vmatpush3.bf16.msra.mxu1 %v988_v7  ;;  %v598_v17 = vpop.permute.xlu1 %597 }
  0xeb   : > { %973 = vmatmul.mubr.msk.f32.vlgmr.msra.gmra.mrb[0].mxu0 %vm625_vm0, %v570_v8  ;;  %979 = vmatmul.mubr.msk.f32.vlgmr.msra.gmra.mrb[0].mxu1 %vm625_vm0, %v574_v9 }
  0xec   : > { %975 = vmatprep.mubr.msk.f32.mxu0 %vm625_vm0, %v571_v10  ;;  %981 = vmatprep.mubr.msk.f32.mxu1 %vm625_vm0, %v575_v11  ;;  %v608_v20 = vpop.permute.xlu1 %607 }
  0xef   : > { %976 = vmatmul.mubr.msk.f32.gmra.mrb[2].mxu0 %vm625_vm0, %v572_v12  ;;  %982 = vmatmul.mubr.msk.f32.gmra.mrb[2].mxu1 %vm625_vm0, %v576_v13 }
  0xf0   : > { %v618_v39 = vpop.permute.xlu1 %617 }
 0x1be   : > { %v974_v21 = vpop.f32.mrb[0].mxu0  ;;  %v980_v22 = vpop.f32.mrb[0].mxu1 }
 0x1bf   : > { %v722_v23 = vadd.f32 %v974_v21, %v593_v14  ;;  %v742_v24 = vadd.f32 %v980_v22, %v613_v18  ;;  %v716_v25 = vpop.f32.mrb[1].mxu0  ;;  %v736_v26 = vpop.f32.mrb[1].mxu1 }
 0x1c0   : > { %v717_v27 = vadd.f32 %v716_v25, %v588_v15  ;;  %v737_v28 = vadd.f32 %v736_v26, %v608_v20 }
 0x1c1   : > { %v756_v30 = vmax.f32 %v722_v23, 0.0  ;;  %v760_v31 = vmax.f32 %v742_v24, 0.0 }
 0x1c2   : > { %v755_v32 = vmax.f32 %v717_v27, 0.0  ;;  %v759_v34 = vmax.f32 %v737_v28, 0.0  ;;  %v977_v33 = vpop.f32.mrb[2].mxu0  ;;  %v983_v36 = vpop.f32.mrb[2].mxu1 }
 0x1c3   : > { %v732_v38 = vadd.f32 %v977_v33, %v603_v16  ;;  %v726_v43 = vpop.f32.mrb[3].mxu0  ;;  %v746_v41 = vpop.f32.mrb[3].mxu1  ;;  %v776_v35 = vsel %vm768_vm1, %v760_v31, 0.0  ;;  %v772_v37 = vsel %vm768_vm1, %v756_v30, 0.0  ;;  %v752_v46 = vadd.f32 %v983_v36, %v623_v29 }
 0x1c4   : > { %v727_v47 = vadd.f32 %v726_v43, %v598_v17  ;;  %v804_v48 = vmax.f32 %v776_v35, 0.0  ;;  %v800_v50 = vmax.f32 %v772_v37, 0.0  ;;  %v747_v40 = vadd.f32 %v746_v41, %v618_v39 }
 0x1c5   : > { %v758_v51 = vmax.f32 %v732_v38, 0.0  ;;  %v775_v49 = vsel %vm768_vm1, %v759_v34, 0.0  ;;  %v771_v52 = vsel %vm768_vm1, %v755_v32, 0.0  ;;  %v762_v56 = vmax.f32 %v752_v46, 0.0 }
 0x1c6   : > { %v757_v42 = vmax.f32 %v727_v47, 0.0  ;;  %836 = vmax.xlane.f32.xlu1 %v804_v48  ;;  %828 = vmax.xlane.f32.xlu0 %v800_v50  ;;  %v803_v53 = vmax.f32 %v775_v49, 0.0  ;;  %v799_v55 = vmax.f32 %v771_v52, 0.0  ;;  %v761_v57 = vmax.f32 %v747_v40, 0.0 }
 0x1c7   : > { %v774_v59 = vsel %vm768_vm1, %v758_v51, 0.0  ;;  %v778_v44 = vsel %vm768_vm1, %v762_v56, 0.0 }
 0x1c8   : > { %v773_v58 = vsel %vm768_vm1, %v757_v42, 0.0  ;;  %v802_v60 = vmax.f32 %v774_v59, 0.0  ;;  %v777_v61 = vsel %vm768_vm1, %v761_v57, 0.0  ;;  %v806_v54 = vmax.f32 %v778_v44, 0.0 }
 0x1c9   : > { %v801_v45 = vmax.f32 %v773_v58, 0.0  ;;  %v805_v63 = vmax.f32 %v777_v61, 0.0 }
 0x1ca   : > { %834 = vmax.xlane.f32.xlu0 %v803_v53  ;;  %826 = vmax.xlane.f32.xlu1 %v799_v55 }
 0x1ce   : > { %830 = vmax.xlane.f32.xlu0 %v801_v45  ;;  %832 = vmax.xlane.f32.xlu1 %v802_v60 }
 0x1d2   : > { %838 = vmax.xlane.f32.xlu0 %v805_v63  ;;  %840 = vmax.xlane.f32.xlu1 %v806_v54 }
 0x253   : > { %v837_v0 = vpop.xlane.xlu1 %836  ;;  %v829_v1 = vpop.xlane.xlu0 %828 }
 0x254   : > { %848 = vst.msk [vmem:[%s326_s14 + $0x28] sm:$0xff] %vm842_vm2, %v837_v0  ;;  %844 = vst.msk [vmem:[%s326_s14 + $0x8] sm:$0xff] %vm842_vm2, %v829_v1 }
 0x257   : > { %v835_v62 = vpop.xlane.xlu0 %834  ;;  %v827_v2 = vpop.xlane.xlu1 %826 }
 0x258   : > { %847 = vst.msk [vmem:[%s326_s14 + $0x20] sm:$0xff] %vm842_vm2, %v835_v62  ;;  %843 = vst.msk [vmem:[%s326_s14] sm:$0xff] %vm842_vm2, %v827_v2 }
 0x25b   : > { %v831_v3 = vpop.xlane.xlu0 %830  ;;  %v833_v4 = vpop.xlane.xlu1 %832 }
 0x25c   : > { %845 = vst.msk [vmem:[%s326_s14 + $0x10] sm:$0xff] %vm842_vm2, %v831_v3  ;;  %846 = vst.msk [vmem:[%s326_s14 + $0x18] sm:$0xff] %vm842_vm2, %v833_v4 }
 0x25f   : > { %v839_v5 = vpop.xlane.xlu0 %838  ;;  %v841_v6 = vpop.xlane.xlu1 %840 }
 0x260   : > { %849 = vst.msk [vmem:[%s326_s14 + $0x30] sm:$0xff] %vm842_vm2, %v839_v5  ;;  %850 = vst.msk [vmem:[%s326_s14 + $0x38] sm:$0xff] %vm842_vm2, %v841_v6 }
 0x261 PF: > { %s17_s26 = sadd.s32 1, %s1065_s26   ;;  %s1279_s24 = smov %s1061_s25 }
 0x262   : > { %p14_p5 = scmp.ge.s32.totalorder %s17_s26, 4   ;;  %s1280_s25 = smov %s1282_s27 }
 0x264   :  { %16 = sbr.rel (!%p14_p5) target bundleno = 2 (0x2), region = 89 }

</bundles_post_ra>
